<compile_context>
chip_gen: v6e
topology: v6e:2x2x1
jax: 0.10.0
libtpu: 0.0.40
codegen_flags: <defaults>
</compile_context>

<pallas_src>
import functools

import jax
import jax.numpy as jnp
from jax.experimental import pallas as pl
from jax.experimental.pallas import tpu as pltpu

EPS = 1e-5


def _full_spec(shape):
    # Whole-array block, single kernel invocation (grid = ()).
    return pl.BlockSpec(shape, lambda: (0,) * len(shape))


def _round_up(n, m):
    return (n + m - 1) // m * m


@functools.lru_cache(maxsize=1)
def _vmem_limit_bytes():
    # Per-generation scoped-VMEM limit (do NOT hard-code 64 MiB: that is the
    # whole physical VMEM of a v7x TensorCore).  Leave ~25% headroom for
    # Mosaic internal scratch / output staging.
    try:
        cap = int(pltpu.get_tpu_info().vmem_capacity_bytes)
    except Exception:
        return None          # fall back to Mosaic defaults
    return (cap * 3) // 4    # ~48 MiB on v7x, ~96 MiB on v5e / v6e


# ------------------------------- fused kernel -------------------------------

def _fused_forward_kernel(
    x_ref,                                   # (Bp, C*H*W)  bf16 (pool folded)
    stem_w_ref,                              # (C*H*W, prev) bf16
    p1w_ref, p1g_ref, p1b_ref,               # projector layer 1
    p2w_ref, p2g_ref, p2b_ref,               # projector layer 2
    p3w_ref, p3b_ref,                        # original encoder.fc (+bias)
    q1w_ref, q1g_ref, q1b_ref,               # predictor layer 1
    q2w_ref, q2b_ref,                        # predictor layer 2
    p_ref, z_ref,                            # outputs (Bp, dim) f32
    *, n_valid,
):
    f32 = jnp.float32
    bf16 = jnp.bfloat16
    bp = x_ref.shape[0]
    inv_n = 1.0 / float(n_valid)

    # Batch-valid mask computed ONCE (n_valid is a static Python int) and
    # reused by all BatchNorm calls; padded rows are excluded from the stats.
    if n_valid == bp:
        mask = None
    else:
        mask = (jax.lax.broadcasted_iota(jnp.int32, (bp, 1), 0) < n_valid
                ).astype(f32)

    def bn_train(y):
        # nn.BatchNorm1d training-mode normalization (biased var, eps=1e-5)
        # over the first n_valid rows only.
        if mask is None:
            mu = jnp.sum(y, axis=0, keepdims=True) * inv_n
            centered = y - mu                         # computed once, reused
            var = jnp.sum(jnp.square(centered), axis=0, keepdims=True) * inv_n
        else:
            mu = jnp.sum(y * mask, axis=0, keepdims=True) * inv_n
            centered = y - mu
            var = jnp.sum(jnp.square(centered) * mask, axis=0,
                          keepdims=True) * inv_n
        return centered * jax.lax.rsqrt(var + EPS)    # rsqrt -> EUP slot

    # --- synthesized backbone trunk: (GAP + linear stem) as ONE bf16 matmul,
    #     pooling already folded into stem_w in the wrapper --- then ReLU.
    h = jnp.dot(x_ref[...], stem_w_ref[...], preferred_element_type=f32)
    h = jnp.maximum(h, 0.0)                                       # (Bp, prev)

    # --- projector MLP (encoder.fc, args.mlp == True) ------------------------
    def linear_bn_relu(a, w_ref, g_ref, b_ref):
        # Linear(bias=False) -> BatchNorm1d(affine) -> ReLU   (training BN)
        y = jnp.dot(a.astype(bf16), w_ref[...], preferred_element_type=f32)
        return jnp.maximum(bn_train(y) * g_ref[...] + b_ref[...], 0.0)

    h = linear_bn_relu(h, p1w_ref, p1g_ref, p1b_ref)              # (Bp, prev)
    h = linear_bn_relu(h, p2w_ref, p2g_ref, p2b_ref)              # (Bp, prev)

    # original encoder.fc: Linear(bias=True) -> BatchNorm1d(affine=False)
    y = jnp.dot(h.astype(bf16), p3w_ref[...], preferred_element_type=f32)
    y = y + p3b_ref[...]
    z = bn_train(y)                                               # (Bp, dim)

    # --- predictor ------------------------------------------------------------
    q = linear_bn_relu(z, q1w_ref, q1g_ref, q1b_ref)              # (Bp, pred)
    p = jnp.dot(q.astype(bf16), q2w_ref[...], preferred_element_type=f32)
    p = p + q2b_ref[...]                                          # (Bp, dim)

    p_ref[...] = p
    z_ref[...] = z


# --------------------------- parameter setup --------------------------------

def _linear_w(key, fan_in, fan_out, dtype=jnp.bfloat16):
    # PyTorch nn.Linear default init scale ~ U(-1/sqrt(fan_in), 1/sqrt(fan_in)).
    # Stored pre-transposed (fan_in, fan_out); bf16 so the kernel does a plain
    # y = x @ W on the MXU at bf16 rate.
    lim = 1.0 / jnp.sqrt(float(fan_in))
    w = jax.random.uniform(key, (fan_in, fan_out), jnp.float32, -lim, lim)
    return w.astype(dtype)


def _linear_b(key, fan_in, fan_out):
    lim = 1.0 / jnp.sqrt(float(fan_in))
    return jax.random.uniform(key, (1, fan_out), jnp.float32, -lim, lim)


def init_params(key, c_in, prev_dim, dim, pred_dim):
    ks = jax.random.split(key, 8)
    p = {}
    # synthesized backbone stem (stand-in for base_encoder trunk); kept f32 so
    # the pool-fold scaling in the wrapper stays exact before the bf16 cast.
    p["stem_w"] = _linear_w(ks[0], c_in, prev_dim, dtype=jnp.float32)
    # projector MLP (encoder.fc, args.mlp == True)
    p["proj1_w"] = _linear_w(ks[1], prev_dim, prev_dim)
    p["proj1_g"] = jnp.ones((1, prev_dim), jnp.float32)
    p["proj1_b"] = jnp.zeros((1, prev_dim), jnp.float32)
    p["proj2_w"] = _linear_w(ks[2], prev_dim, prev_dim)
    p["proj2_g"] = jnp.ones((1, prev_dim), jnp.float32)
    p["proj2_b"] = jnp.zeros((1, prev_dim), jnp.float32)
    p["proj3_w"] = _linear_w(ks[3], prev_dim, dim)       # original encoder.fc
    p["proj3_b"] = _linear_b(ks[4], prev_dim, dim)       # bias (frozen in torch)
    # predictor
    p["pred1_w"] = _linear_w(ks[5], dim, pred_dim)
    p["pred1_g"] = jnp.ones((1, pred_dim), jnp.float32)
    p["pred1_b"] = jnp.zeros((1, pred_dim), jnp.float32)
    p["pred2_w"] = _linear_w(ks[6], pred_dim, dim)
    p["pred2_b"] = _linear_b(ks[7], pred_dim, dim)
    return p


# ------------------------------ forward ------------------------------------

def model_with_predictor_forward(params, x):
    # x: (B, C, H, W)  NCHW
    B, C, H, W = x.shape
    hw = H * W

    # Pad batch to a multiple of 16: bf16 LHS packs 16 rows per vreg.
    Bp = max(16, _round_up(B, 16))

    # Fold the global average pool into the stem: x -> (Bp, C*H*W) bf16,
    # stem_w -> (C*H*W, prev) scaled by 1/HW, so pool+stem is one MXU matmul.
    x2d = x.reshape(B, C * hw).astype(jnp.bfloat16)
    if Bp != B:
        x2d = jnp.pad(x2d, ((0, Bp - B), (0, 0)))
    stem_w_exp = (jnp.repeat(params["stem_w"].astype(jnp.float32), hw, axis=0)
                  * (1.0 / hw)).astype(jnp.bfloat16)

    dim = params["pred2_w"].shape[1]

    inputs = (
        x2d,
        stem_w_exp,
        params["proj1_w"], params["proj1_g"], params["proj1_b"],
        params["proj2_w"], params["proj2_g"], params["proj2_b"],
        params["proj3_w"], params["proj3_b"],
        params["pred1_w"], params["pred1_g"], params["pred1_b"],
        params["pred2_w"], params["pred2_b"],
    )

    kernel = functools.partial(_fused_forward_kernel, n_valid=B)

    p_pad, z_pad = pl.pallas_call(
        kernel,
        out_shape=(jax.ShapeDtypeStruct((Bp, dim), jnp.float32),
                   jax.ShapeDtypeStruct((Bp, dim), jnp.float32)),
        in_specs=[_full_spec(a.shape) for a in inputs],
        out_specs=(_full_spec((Bp, dim)), _full_spec((Bp, dim))),
        compiler_params=pltpu.CompilerParams(
            vmem_limit_bytes=_vmem_limit_bytes()),
    )(*inputs)

    return p_pad[:B], z_pad[:B]


if __name__ == "__main__":
    # Demo shapes: lane-aligned feature dims (128); real SimSiam would use
    # prev_dim=2048, dim=2048, pred_dim=512 (see TODOs for the tiled version).
    B, C, H, W = 2, 3, 16, 16
    prev_dim, dim, pred_dim = 128, 128, 128

    key = jax.random.PRNGKey(0)
    k_x, k_p = jax.random.split(key)
    x = jax.random.normal(k_x, (B, C, H, W), jnp.float32)
    params = init_params(k_p, C, prev_dim, dim, pred_dim)

    fwd = jax.jit(model_with_predictor_forward)
    p, z = fwd(params, x)
    jax.block_until_ready((p, z))

    assert p.shape == (B, dim) and z.shape == (B, dim)
    assert jnp.all(jnp.isfinite(p)) and jnp.all(jnp.isfinite(z))
    print("KERNEL_OK")
</pallas_src>

<mosaic_0001>
module attributes {stable_mosaic.version = 11 : i64} {
  func.func @_fused_forward_kernel(%arg0: memref<16x768xbf16, #tpu.memory_space<vmem>>, %arg1: memref<768x128xbf16, #tpu.memory_space<vmem>>, %arg2: memref<128x128xbf16, #tpu.memory_space<vmem>>, %arg3: memref<1x128xf32, #tpu.memory_space<vmem>>, %arg4: memref<1x128xf32, #tpu.memory_space<vmem>>, %arg5: memref<128x128xbf16, #tpu.memory_space<vmem>>, %arg6: memref<1x128xf32, #tpu.memory_space<vmem>>, %arg7: memref<1x128xf32, #tpu.memory_space<vmem>>, %arg8: memref<128x128xbf16, #tpu.memory_space<vmem>>, %arg9: memref<1x128xf32, #tpu.memory_space<vmem>>, %arg10: memref<128x128xbf16, #tpu.memory_space<vmem>>, %arg11: memref<1x128xf32, #tpu.memory_space<vmem>>, %arg12: memref<1x128xf32, #tpu.memory_space<vmem>>, %arg13: memref<128x128xbf16, #tpu.memory_space<vmem>>, %arg14: memref<1x128xf32, #tpu.memory_space<vmem>>, %arg15: memref<16x128xf32, #tpu.memory_space<vmem>>, %arg16: memref<16x128xf32, #tpu.memory_space<vmem>>) attributes {dimension_semantics = [], scalar_prefetch = 0 : i64, scratch_operands = 0 : i64, tpu.core_type = #tpu.core_type<tc>} {
    %0 = tpu.iota {dimensions = array<i32: 0>} : vector<16x1xi32>
    %c2_i32 = arith.constant 2 : i32
    %1 = vector.broadcast %c2_i32 : i32 to vector<16x1xi32>
    %2 = arith.cmpi slt, %0, %1 : vector<16x1xi32>
    %3 = arith.extui %2 : vector<16x1xi1> to vector<16x1xi32>
    %4 = arith.sitofp %3 : vector<16x1xi32> to vector<16x1xf32>
    %c0 = arith.constant 0 : index
    %c0_0 = arith.constant 0 : index
    %5 = vector.load %arg0[%c0, %c0_0] : memref<16x768xbf16, #tpu.memory_space<vmem>>, vector<16x768xbf16>
    %c0_1 = arith.constant 0 : index
    %c0_2 = arith.constant 0 : index
    %6 = vector.load %arg1[%c0_1, %c0_2] : memref<768x128xbf16, #tpu.memory_space<vmem>>, vector<768x128xbf16>
    %cst = arith.constant dense<0.000000e+00> : vector<16x128xf32>
    %7 = tpu.matmul %5, %6, %cst {dimension_numbers = #tpu.dot_dimension_numbers<[1], [0], [0], [1], [0, 0, 1, 1], [], []>} : vector<16x768xbf16>, vector<768x128xbf16>, vector<16x128xf32> -> vector<16x128xf32>
    %cst_3 = arith.constant 0.000000e+00 : f32
    %8 = vector.broadcast %cst_3 : f32 to vector<16x128xf32>
    %9 = arith.maximumf %7, %8 : vector<16x128xf32>
    %10 = arith.truncf %9 : vector<16x128xf32> to vector<16x128xbf16>
    %c0_4 = arith.constant 0 : index
    %c0_5 = arith.constant 0 : index
    %11 = vector.load %arg2[%c0_4, %c0_5] : memref<128x128xbf16, #tpu.memory_space<vmem>>, vector<128x128xbf16>
    %cst_6 = arith.constant dense<0.000000e+00> : vector<16x128xf32>
    %12 = tpu.matmul %10, %11, %cst_6 {dimension_numbers = #tpu.dot_dimension_numbers<[1], [0], [0], [1], [0, 0, 1, 1], [], []>} : vector<16x128xbf16>, vector<128x128xbf16>, vector<16x128xf32> -> vector<16x128xf32>
    %13 = vector.broadcast %4 : vector<16x1xf32> to vector<16x128xf32>
    %14 = arith.mulf %12, %13 : vector<16x128xf32>
    %cst_7 = arith.constant dense<0.000000e+00> : vector<128xf32>
    %15 = vector.multi_reduction <add>, %14, %cst_7 [0] : vector<16x128xf32> to vector<128xf32>
    %16 = vector.shape_cast %15 : vector<128xf32> to vector<1x128xf32>
    %cst_8 = arith.constant 5.000000e-01 : f32
    %17 = vector.broadcast %cst_8 : f32 to vector<1x128xf32>
    %18 = arith.mulf %16, %17 : vector<1x128xf32>
    %19 = vector.broadcast %18 : vector<1x128xf32> to vector<16x128xf32>
    %20 = arith.subf %12, %19 : vector<16x128xf32>
    %21 = arith.mulf %20, %20 : vector<16x128xf32>
    %22 = vector.broadcast %4 : vector<16x1xf32> to vector<16x128xf32>
    %23 = arith.mulf %21, %22 : vector<16x128xf32>
    %cst_9 = arith.constant dense<0.000000e+00> : vector<128xf32>
    %24 = vector.multi_reduction <add>, %23, %cst_9 [0] : vector<16x128xf32> to vector<128xf32>
    %25 = vector.shape_cast %24 : vector<128xf32> to vector<1x128xf32>
    %cst_10 = arith.constant 5.000000e-01 : f32
    %26 = vector.broadcast %cst_10 : f32 to vector<1x128xf32>
    %27 = arith.mulf %25, %26 : vector<1x128xf32>
    %cst_11 = arith.constant 9.99999974E-6 : f32
    %28 = vector.broadcast %cst_11 : f32 to vector<1x128xf32>
    %29 = arith.addf %27, %28 : vector<1x128xf32>
    %30 = math.rsqrt %29 : vector<1x128xf32>
    %31 = vector.broadcast %30 : vector<1x128xf32> to vector<16x128xf32>
    %32 = arith.mulf %20, %31 : vector<16x128xf32>
    %c0_12 = arith.constant 0 : index
    %c0_13 = arith.constant 0 : index
    %33 = vector.load %arg3[%c0_12, %c0_13] : memref<1x128xf32, #tpu.memory_space<vmem>>, vector<1x128xf32>
    %34 = vector.broadcast %33 : vector<1x128xf32> to vector<16x128xf32>
    %35 = arith.mulf %32, %34 : vector<16x128xf32>
    %c0_14 = arith.constant 0 : index
    %c0_15 = arith.constant 0 : index
    %36 = vector.load %arg4[%c0_14, %c0_15] : memref<1x128xf32, #tpu.memory_space<vmem>>, vector<1x128xf32>
    %37 = vector.broadcast %36 : vector<1x128xf32> to vector<16x128xf32>
    %38 = arith.addf %35, %37 : vector<16x128xf32>
    %cst_16 = arith.constant 0.000000e+00 : f32
    %39 = vector.broadcast %cst_16 : f32 to vector<16x128xf32>
    %40 = arith.maximumf %38, %39 : vector<16x128xf32>
    %41 = arith.truncf %40 : vector<16x128xf32> to vector<16x128xbf16>
    %c0_17 = arith.constant 0 : index
    %c0_18 = arith.constant 0 : index
    %42 = vector.load %arg5[%c0_17, %c0_18] : memref<128x128xbf16, #tpu.memory_space<vmem>>, vector<128x128xbf16>
    %cst_19 = arith.constant dense<0.000000e+00> : vector<16x128xf32>
    %43 = tpu.matmul %41, %42, %cst_19 {dimension_numbers = #tpu.dot_dimension_numbers<[1], [0], [0], [1], [0, 0, 1, 1], [], []>} : vector<16x128xbf16>, vector<128x128xbf16>, vector<16x128xf32> -> vector<16x128xf32>
    %44 = vector.broadcast %4 : vector<16x1xf32> to vector<16x128xf32>
    %45 = arith.mulf %43, %44 : vector<16x128xf32>
    %cst_20 = arith.constant dense<0.000000e+00> : vector<128xf32>
    %46 = vector.multi_reduction <add>, %45, %cst_20 [0] : vector<16x128xf32> to vector<128xf32>
    %47 = vector.shape_cast %46 : vector<128xf32> to vector<1x128xf32>
    %cst_21 = arith.constant 5.000000e-01 : f32
    %48 = vector.broadcast %cst_21 : f32 to vector<1x128xf32>
    %49 = arith.mulf %47, %48 : vector<1x128xf32>
    %50 = vector.broadcast %49 : vector<1x128xf32> to vector<16x128xf32>
    %51 = arith.subf %43, %50 : vector<16x128xf32>
    %52 = arith.mulf %51, %51 : vector<16x128xf32>
    %53 = vector.broadcast %4 : vector<16x1xf32> to vector<16x128xf32>
    %54 = arith.mulf %52, %53 : vector<16x128xf32>
    %cst_22 = arith.constant dense<0.000000e+00> : vector<128xf32>
    %55 = vector.multi_reduction <add>, %54, %cst_22 [0] : vector<16x128xf32> to vector<128xf32>
    %56 = vector.shape_cast %55 : vector<128xf32> to vector<1x128xf32>
    %cst_23 = arith.constant 5.000000e-01 : f32
    %57 = vector.broadcast %cst_23 : f32 to vector<1x128xf32>
    %58 = arith.mulf %56, %57 : vector<1x128xf32>
    %cst_24 = arith.constant 9.99999974E-6 : f32
    %59 = vector.broadcast %cst_24 : f32 to vector<1x128xf32>
    %60 = arith.addf %58, %59 : vector<1x128xf32>
    %61 = math.rsqrt %60 : vector<1x128xf32>
    %62 = vector.broadcast %61 : vector<1x128xf32> to vector<16x128xf32>
    %63 = arith.mulf %51, %62 : vector<16x128xf32>
    %c0_25 = arith.constant 0 : index
    %c0_26 = arith.constant 0 : index
    %64 = vector.load %arg6[%c0_25, %c0_26] : memref<1x128xf32, #tpu.memory_space<vmem>>, vector<1x128xf32>
    %65 = vector.broadcast %64 : vector<1x128xf32> to vector<16x128xf32>
    %66 = arith.mulf %63, %65 : vector<16x128xf32>
    %c0_27 = arith.constant 0 : index
    %c0_28 = arith.constant 0 : index
    %67 = vector.load %arg7[%c0_27, %c0_28] : memref<1x128xf32, #tpu.memory_space<vmem>>, vector<1x128xf32>
    %68 = vector.broadcast %67 : vector<1x128xf32> to vector<16x128xf32>
    %69 = arith.addf %66, %68 : vector<16x128xf32>
    %cst_29 = arith.constant 0.000000e+00 : f32
    %70 = vector.broadcast %cst_29 : f32 to vector<16x128xf32>
    %71 = arith.maximumf %69, %70 : vector<16x128xf32>
    %72 = arith.truncf %71 : vector<16x128xf32> to vector<16x128xbf16>
    %c0_30 = arith.constant 0 : index
    %c0_31 = arith.constant 0 : index
    %73 = vector.load %arg8[%c0_30, %c0_31] : memref<128x128xbf16, #tpu.memory_space<vmem>>, vector<128x128xbf16>
    %cst_32 = arith.constant dense<0.000000e+00> : vector<16x128xf32>
    %74 = tpu.matmul %72, %73, %cst_32 {dimension_numbers = #tpu.dot_dimension_numbers<[1], [0], [0], [1], [0, 0, 1, 1], [], []>} : vector<16x128xbf16>, vector<128x128xbf16>, vector<16x128xf32> -> vector<16x128xf32>
    %c0_33 = arith.constant 0 : index
    %c0_34 = arith.constant 0 : index
    %75 = vector.load %arg9[%c0_33, %c0_34] : memref<1x128xf32, #tpu.memory_space<vmem>>, vector<1x128xf32>
    %76 = vector.broadcast %75 : vector<1x128xf32> to vector<16x128xf32>
    %77 = arith.addf %74, %76 : vector<16x128xf32>
    %78 = vector.broadcast %4 : vector<16x1xf32> to vector<16x128xf32>
    %79 = arith.mulf %77, %78 : vector<16x128xf32>
    %cst_35 = arith.constant dense<0.000000e+00> : vector<128xf32>
    %80 = vector.multi_reduction <add>, %79, %cst_35 [0] : vector<16x128xf32> to vector<128xf32>
    %81 = vector.shape_cast %80 : vector<128xf32> to vector<1x128xf32>
    %cst_36 = arith.constant 5.000000e-01 : f32
    %82 = vector.broadcast %cst_36 : f32 to vector<1x128xf32>
    %83 = arith.mulf %81, %82 : vector<1x128xf32>
    %84 = vector.broadcast %83 : vector<1x128xf32> to vector<16x128xf32>
    %85 = arith.subf %77, %84 : vector<16x128xf32>
    %86 = arith.mulf %85, %85 : vector<16x128xf32>
    %87 = vector.broadcast %4 : vector<16x1xf32> to vector<16x128xf32>
    %88 = arith.mulf %86, %87 : vector<16x128xf32>
    %cst_37 = arith.constant dense<0.000000e+00> : vector<128xf32>
    %89 = vector.multi_reduction <add>, %88, %cst_37 [0] : vector<16x128xf32> to vector<128xf32>
    %90 = vector.shape_cast %89 : vector<128xf32> to vector<1x128xf32>
    %cst_38 = arith.constant 5.000000e-01 : f32
    %91 = vector.broadcast %cst_38 : f32 to vector<1x128xf32>
    %92 = arith.mulf %90, %91 : vector<1x128xf32>
    %cst_39 = arith.constant 9.99999974E-6 : f32
    %93 = vector.broadcast %cst_39 : f32 to vector<1x128xf32>
    %94 = arith.addf %92, %93 : vector<1x128xf32>
    %95 = math.rsqrt %94 : vector<1x128xf32>
    %96 = vector.broadcast %95 : vector<1x128xf32> to vector<16x128xf32>
    %97 = arith.mulf %85, %96 : vector<16x128xf32>
    %98 = arith.truncf %97 : vector<16x128xf32> to vector<16x128xbf16>
    %c0_40 = arith.constant 0 : index
    %c0_41 = arith.constant 0 : index
    %99 = vector.load %arg10[%c0_40, %c0_41] : memref<128x128xbf16, #tpu.memory_space<vmem>>, vector<128x128xbf16>
    %cst_42 = arith.constant dense<0.000000e+00> : vector<16x128xf32>
    %100 = tpu.matmul %98, %99, %cst_42 {dimension_numbers = #tpu.dot_dimension_numbers<[1], [0], [0], [1], [0, 0, 1, 1], [], []>} : vector<16x128xbf16>, vector<128x128xbf16>, vector<16x128xf32> -> vector<16x128xf32>
    %101 = vector.broadcast %4 : vector<16x1xf32> to vector<16x128xf32>
    %102 = arith.mulf %100, %101 : vector<16x128xf32>
    %cst_43 = arith.constant dense<0.000000e+00> : vector<128xf32>
    %103 = vector.multi_reduction <add>, %102, %cst_43 [0] : vector<16x128xf32> to vector<128xf32>
    %104 = vector.shape_cast %103 : vector<128xf32> to vector<1x128xf32>
    %cst_44 = arith.constant 5.000000e-01 : f32
    %105 = vector.broadcast %cst_44 : f32 to vector<1x128xf32>
    %106 = arith.mulf %104, %105 : vector<1x128xf32>
    %107 = vector.broadcast %106 : vector<1x128xf32> to vector<16x128xf32>
    %108 = arith.subf %100, %107 : vector<16x128xf32>
    %109 = arith.mulf %108, %108 : vector<16x128xf32>
    %110 = vector.broadcast %4 : vector<16x1xf32> to vector<16x128xf32>
    %111 = arith.mulf %109, %110 : vector<16x128xf32>
    %cst_45 = arith.constant dense<0.000000e+00> : vector<128xf32>
    %112 = vector.multi_reduction <add>, %111, %cst_45 [0] : vector<16x128xf32> to vector<128xf32>
    %113 = vector.shape_cast %112 : vector<128xf32> to vector<1x128xf32>
    %cst_46 = arith.constant 5.000000e-01 : f32
    %114 = vector.broadcast %cst_46 : f32 to vector<1x128xf32>
    %115 = arith.mulf %113, %114 : vector<1x128xf32>
    %cst_47 = arith.constant 9.99999974E-6 : f32
    %116 = vector.broadcast %cst_47 : f32 to vector<1x128xf32>
    %117 = arith.addf %115, %116 : vector<1x128xf32>
    %118 = math.rsqrt %117 : vector<1x128xf32>
    %119 = vector.broadcast %118 : vector<1x128xf32> to vector<16x128xf32>
    %120 = arith.mulf %108, %119 : vector<16x128xf32>
    %c0_48 = arith.constant 0 : index
    %c0_49 = arith.constant 0 : index
    %121 = vector.load %arg11[%c0_48, %c0_49] : memref<1x128xf32, #tpu.memory_space<vmem>>, vector<1x128xf32>
    %122 = vector.broadcast %121 : vector<1x128xf32> to vector<16x128xf32>
    %123 = arith.mulf %120, %122 : vector<16x128xf32>
    %c0_50 = arith.constant 0 : index
    %c0_51 = arith.constant 0 : index
    %124 = vector.load %arg12[%c0_50, %c0_51] : memref<1x128xf32, #tpu.memory_space<vmem>>, vector<1x128xf32>
    %125 = vector.broadcast %124 : vector<1x128xf32> to vector<16x128xf32>
    %126 = arith.addf %123, %125 : vector<16x128xf32>
    %cst_52 = arith.constant 0.000000e+00 : f32
    %127 = vector.broadcast %cst_52 : f32 to vector<16x128xf32>
    %128 = arith.maximumf %126, %127 : vector<16x128xf32>
    %129 = arith.truncf %128 : vector<16x128xf32> to vector<16x128xbf16>
    %c0_53 = arith.constant 0 : index
    %c0_54 = arith.constant 0 : index
    %130 = vector.load %arg13[%c0_53, %c0_54] : memref<128x128xbf16, #tpu.memory_space<vmem>>, vector<128x128xbf16>
    %cst_55 = arith.constant dense<0.000000e+00> : vector<16x128xf32>
    %131 = tpu.matmul %129, %130, %cst_55 {dimension_numbers = #tpu.dot_dimension_numbers<[1], [0], [0], [1], [0, 0, 1, 1], [], []>} : vector<16x128xbf16>, vector<128x128xbf16>, vector<16x128xf32> -> vector<16x128xf32>
    %c0_56 = arith.constant 0 : index
    %c0_57 = arith.constant 0 : index
    %132 = vector.load %arg14[%c0_56, %c0_57] : memref<1x128xf32, #tpu.memory_space<vmem>>, vector<1x128xf32>
    %133 = vector.broadcast %132 : vector<1x128xf32> to vector<16x128xf32>
    %134 = arith.addf %131, %133 : vector<16x128xf32>
    %c0_58 = arith.constant 0 : index
    %c0_59 = arith.constant 0 : index
    %135 = vector.load %arg15[%c0_58, %c0_59] : memref<16x128xf32, #tpu.memory_space<vmem>>, vector<16x128xf32>
    tpu.vector_store %arg15[%c0_58, %c0_59], %134 {strides = array<i32>} : memref<16x128xf32, #tpu.memory_space<vmem>>, vector<16x128xf32>,
    %c0_60 = arith.constant 0 : index
    %c0_61 = arith.constant 0 : index
    %136 = vector.load %arg16[%c0_60, %c0_61] : memref<16x128xf32, #tpu.memory_space<vmem>>, vector<16x128xf32>
    tpu.vector_store %arg16[%c0_60, %c0_61], %97 {strides = array<i32>} : memref<16x128xf32, #tpu.memory_space<vmem>>, vector<16x128xf32>,
    return
  }
}

</mosaic_0001>

<bundles_post_ra>
// kernel: model_with_predictor_forward.1
= control target key start
LH: loop header
LB: loop body
LE: loop exit
PB: predicated region body
PF: predicated region fallthrough
CT: control target
= control target key end

     0   :  { %v1756_v54 = vmov 0.0   ;;  %vm1757_vm0 = vmmov 0   ;;  %s2222_s1 = inlined_call_operand.vmem [shape: bf16[768,128], index: 1, kind: input, shape index: {}]   ;;  %s2223_s0 = inlined_call_operand.vmem [shape: bf16[16,768], index: 0, kind: input, shape index: {}]   ;;  %s2224_s2 = inlined_call_operand.vmem [shape: bf16[128,128], index: 2, kind: input, shape index: {}]   ;;  %s2225_s5 = inlined_call_operand.vmem [shape: bf16[128,128], index: 5, kind: input, shape index: {}]   ;;  %s2226_s3 = inlined_call_operand.vmem [shape: f32[1,128], index: 3, kind: input, shape index: {}]   ;;  %s2227_s4 = inlined_call_operand.vmem [shape: f32[1,128], index: 4, kind: input, shape index: {}]   ;;  %s2228_s8 = inlined_call_operand.vmem [shape: bf16[128,128], index: 8, kind: input, shape index: {}]   ;;  %s2229_s6 = inlined_call_operand.vmem [shape: f32[1,128], index: 6, kind: input, shape index: {}]   ;;  %s2230_s7 = inlined_call_operand.vmem [shape: f32[1,128], index: 7, kind: input, shape index: {}]   ;;  %s2231_s10 = inlined_call_operand.vmem [shape: bf16[128,128], index: 10, kind: input, shape index: {}]   ;;  %s2232_s9 = inlined_call_operand.vmem [shape: f32[1,128], index: 9, kind: input, shape index: {}]   ;;  %s2233_s16 = inlined_call_operand.vmem [shape: f32[16,128], index: 16, kind: output, shape index: {1}]   ;;  %s2234_s13 = inlined_call_operand.vmem [shape: bf16[128,128], index: 13, kind: input, shape index: {}]   ;;  %s2235_s11 = inlined_call_operand.vmem [shape: f32[1,128], index: 11, kind: input, shape index: {}]   ;;  %s2236_s12 = inlined_call_operand.vmem [shape: f32[1,128], index: 12, kind: input, shape index: {}]   ;;  %s2237_s14 = inlined_call_operand.vmem [shape: f32[1,128], index: 14, kind: input, shape index: {}]   ;;  %s2238_s15 = inlined_call_operand.vmem [shape: f32[16,128], index: 15, kind: output, shape index: {0}]  }
   0x1   :  { %2240 = sst [smem:[#allocation2_spill]] %s2222_s1  ;;  %v1683_v32 = vld [vmem:[%s2223_s0] ss:$24 sps:$4 sm:$0xff]   ;;  %v1685_v33 = vld [vmem:[%s2223_s0 + $0x4] ss:$24 sps:$4 sm:$0xff]   ;;  %v1709_v56 = vld [vmem:[%s2224_s2 + $0x30] sm:$0xff]  }
   0x2   :  { %s2241_s23 = sld [smem:[#allocation2_spill]]  ;;  %v1686_v34 = vld [vmem:[%s2223_s0 + $0x8] ss:$24 sps:$4 sm:$0xff]   ;;  %v1688_v35 = vld [vmem:[%s2223_s0 + $0xc] ss:$24 sps:$4 sm:$0xff]   ;;  %514 = vmatprep.mubr.bf16.mxu0 %v1685_v33  ;;  %v1708_v55 = vld [vmem:[%s2224_s2 + $0x38] sm:$0xff]  }
   0x3   :  { %555 = vmatprep.mubr.bf16.mxu1 %v1688_v35  ;;  %v1707_v47 = vld [vmem:[%s2223_s0 + $0x14] ss:$24 sps:$4 sm:$0xff]   ;;  %v1705_v53 = vld [vmem:[%s2223_s0 + $0x10] ss:$24 sps:$4 sm:$0xff]   ;;  %v1711_v58 = vld [vmem:[%s2224_s2 + $0x20] sm:$0xff]  }
   0x4   :  { %v1710_v57 = vld [vmem:[%s2224_s2 + $0x28] sm:$0xff]   ;;  %v1712_v59 = vld [vmem:[%s2224_s2 + $0x18] sm:$0xff]   ;;  %v1713_v60 = vld [vmem:[%s2224_s2 + $0x10] sm:$0xff]  }
   0x5   :  { %v1714_v61 = vld [vmem:[%s2224_s2 + $0x8] sm:$0xff]   ;;  %v1715_v62 = vld [vmem:[%s2224_s2] sm:$0xff]  }
   0x8   :  { %v1651_v0 = vld [vmem:[%s2241_s23 + $0x78] sm:$0xff]   ;;  %v1655_v4 = vld [vmem:[%s2241_s23 + $0x70] sm:$0xff]   ;;  %v1659_v8 = vld [vmem:[%s2241_s23 + $0x68] sm:$0xff]  }
   0x9   :  { %v1652_v1 = vld [vmem:[%s2241_s23 + $0xf8] sm:$0xff]   ;;  %1438 = vmatprep.subr.bf16.mxu0 %v1651_v0  ;;  %v1656_v5 = vld [vmem:[%s2241_s23 + $0xf0] sm:$0xff]   ;;  %v1660_v9 = vld [vmem:[%s2241_s23 + $0xe8] sm:$0xff]  }
   0xa   :  { %v1653_v2 = vld [vmem:[%s2241_s23 + $0x38] sm:$0xff]   ;;  %1460 = vmatprep.subr.bf16.mxu1 %v1652_v1  ;;  %v1657_v6 = vld [vmem:[%s2241_s23 + $0x30] sm:$0xff]   ;;  %v1661_v10 = vld [vmem:[%s2241_s23 + $0x28] sm:$0xff]  }
   0xb   :  { %v1654_v3 = vld [vmem:[%s2241_s23 + $0xb8] sm:$0xff]   ;;  %1439 = vmatpush3.bf16.msra.mxu0 %v1653_v2  ;;  %v1658_v7 = vld [vmem:[%s2241_s23 + $0xb0] sm:$0xff]   ;;  %v1662_v11 = vld [vmem:[%s2241_s23 + $0xa8] sm:$0xff]  }
   0xc   :  { %1461 = vmatpush3.bf16.msra.mxu1 %v1654_v3  ;;  %1440 = vmatprep.subr.bf16.mxu0 %v1655_v4  ;;  %v1663_v12 = vld [vmem:[%s2241_s23 + $0x60] sm:$0xff]   ;;  %v1667_v16 = vld [vmem:[%s2241_s23 + $0x58] sm:$0xff]   ;;  %v1671_v20 = vld [vmem:[%s2241_s23 + $0x50] sm:$0xff]  }
   0xd   :  { %1462 = vmatprep.subr.bf16.mxu1 %v1656_v5  ;;  %v1664_v13 = vld [vmem:[%s2241_s23 + $0xe0] sm:$0xff]   ;;  %v1668_v17 = vld [vmem:[%s2241_s23 + $0xd8] sm:$0xff]   ;;  %v1672_v21 = vld [vmem:[%s2241_s23 + $0xd0] sm:$0xff]  }
   0xe   :  { %v1665_v14 = vld [vmem:[%s2241_s23 + $0x20] sm:$0xff]   ;;  %v1669_v18 = vld [vmem:[%s2241_s23 + $0x18] sm:$0xff]   ;;  %v1673_v22 = vld [vmem:[%s2241_s23 + $0x10] sm:$0xff]  }
   0xf   :  { %1441 = vmatpush3.bf16.msra.mxu0 %v1657_v6  ;;  %v1666_v15 = vld [vmem:[%s2241_s23 + $0xa0] sm:$0xff]   ;;  %v1670_v19 = vld [vmem:[%s2241_s23 + $0x98] sm:$0xff]   ;;  %v1674_v23 = vld [vmem:[%s2241_s23 + $0x90] sm:$0xff]  }
  0x10   :  { %1463 = vmatpush3.bf16.msra.mxu1 %v1658_v7  ;;  %1442 = vmatprep.subr.bf16.mxu0 %v1659_v8  ;;  %v1675_v24 = vld [vmem:[%s2241_s23 + $0x48] sm:$0xff]   ;;  %v1679_v28 = vld [vmem:[%s2241_s23 + $0x40] sm:$0xff]   ;;  %v1689_v36 = vld [vmem:[%s2241_s23 + $0x178] sm:$0xff]  }
  0x11   :  { %1464 = vmatprep.subr.bf16.mxu1 %v1660_v9  ;;  %v1676_v25 = vld [vmem:[%s2241_s23 + $0xc8] sm:$0xff]   ;;  %v1680_v29 = vld [vmem:[%s2241_s23 + $0xc0] sm:$0xff]   ;;  %v1690_v37 = vld [vmem:[%s2241_s23 + $0x138] sm:$0xff]  }
  0x12   :  { %v1677_v26 = vld [vmem:[%s2241_s23 + $0x8] sm:$0xff]   ;;  %v1681_v30 = vld [vmem:[%s2241_s23] sm:$0xff]   ;;  %v1691_v38 = vld [vmem:[%s2241_s23 + $0x170] sm:$0xff]  }
  0x13   :  { %1443 = vmatpush3.bf16.msra.mxu0 %v1661_v10  ;;  %v1678_v27 = vld [vmem:[%s2241_s23 + $0x88] sm:$0xff]   ;;  %v1682_v31 = vld [vmem:[%s2241_s23 + $0x80] sm:$0xff]   ;;  %v1692_v39 = vld [vmem:[%s2241_s23 + $0x130] sm:$0xff]  }
  0x14   :  { %1465 = vmatpush3.bf16.msra.mxu1 %v1662_v11  ;;  %1444 = vmatprep.subr.bf16.mxu0 %v1663_v12  ;;  %v1693_v40 = vld [vmem:[%s2241_s23 + $0x168] sm:$0xff]   ;;  %v1695_v42 = vld [vmem:[%s2241_s23 + $0x160] sm:$0xff]   ;;  %v1697_v44 = vld [vmem:[%s2241_s23 + $0x158] sm:$0xff]  }
  0x15   :  { %1466 = vmatprep.subr.bf16.mxu1 %v1664_v13  ;;  %v1694_v41 = vld [vmem:[%s2241_s23 + $0x128] sm:$0xff]   ;;  %v1696_v43 = vld [vmem:[%s2241_s23 + $0x120] sm:$0xff]   ;;  %v1698_v45 = vld [vmem:[%s2241_s23 + $0x118] sm:$0xff]  }
  0x16   :  { %v1699_v46 = vld [vmem:[%s2241_s23 + $0x150] sm:$0xff]   ;;  %v1701_v49 = vld [vmem:[%s2241_s23 + $0x148] sm:$0xff]   ;;  %v1703_v51 = vld [vmem:[%s2241_s23 + $0x140] sm:$0xff]  }
  0x17   :  { %1445 = vmatpush3.bf16.msra.mxu0 %v1665_v14  ;;  %v1700_v48 = vld [vmem:[%s2241_s23 + $0x110] sm:$0xff]   ;;  %v1702_v50 = vld [vmem:[%s2241_s23 + $0x108] sm:$0xff]   ;;  %v1704_v52 = vld [vmem:[%s2241_s23 + $0x100] sm:$0xff]  }
  0x18   :  { %1467 = vmatpush3.bf16.msra.mxu1 %v1666_v15  ;;  %1446 = vmatprep.subr.bf16.mxu0 %v1667_v16 }
  0x19   :  { %1468 = vmatprep.subr.bf16.mxu1 %v1668_v17 }
  0x1b   :  { %1447 = vmatpush3.bf16.msra.mxu0 %v1669_v18 }
  0x1c   :  { %1469 = vmatpush3.bf16.msra.mxu1 %v1670_v19  ;;  %1448 = vmatprep.subr.bf16.mxu0 %v1671_v20 }
  0x1d   :  { %1470 = vmatprep.subr.bf16.mxu1 %v1672_v21 }
  0x1f   :  { %1449 = vmatpush3.bf16.msra.mxu0 %v1673_v22 }
  0x20   :  { %1471 = vmatpush3.bf16.msra.mxu1 %v1674_v23  ;;  %1450 = vmatprep.subr.bf16.mxu0 %v1675_v24  ;;  %v1716_v24 = vld [vmem:[%s2225_s5 + $0x38] sm:$0xff]  }
  0x21   :  { %1472 = vmatprep.subr.bf16.mxu1 %v1676_v25  ;;  %v1717_v25 = vld [vmem:[%s2225_s5 + $0x30] sm:$0xff]  }
  0x23   :  { %1451 = vmatpush3.bf16.msra.mxu0 %v1677_v26  ;;  %v1718_v26 = vld [vmem:[%s2225_s5 + $0x28] sm:$0xff]  }
  0x24   :  { %1473 = vmatpush3.bf16.msra.mxu1 %v1678_v27  ;;  %1452 = vmatprep.subr.bf16.mxu0 %v1679_v28  ;;  %v1719_v27 = vld [vmem:[%s2225_s5 + $0x20] sm:$0xff]   ;;  %v1720_v28 = vld [vmem:[%s2225_s5 + $0x18] sm:$0xff]  }
  0x25   :  { %1474 = vmatprep.subr.bf16.mxu1 %v1680_v29  ;;  %v1721_v29 = vld [vmem:[%s2225_s5 + $0x10] sm:$0xff]  }
  0x27   :  { %1453 = vmatpush3.bf16.msra.mxu0 %v1681_v30  ;;  %v1722_v30 = vld [vmem:[%s2225_s5 + $0x8] sm:$0xff]  }
  0x28   :  { %1475 = vmatpush3.bf16.msra.mxu1 %v1682_v31  ;;  %1482 = vmatprep.subr.bf16.mxu0 %v1689_v36  ;;  %v1723_v31 = vld [vmem:[%s2225_s5] sm:$0xff]  }
  0x29   :  { %1549 = vmatprep.subr.bf16.mxu1 %v1756_v54 }
  0x2a   :  { %515 = vmatmul.mubr.bf16.vlgmr.msra.gmra.mxu0 %v1683_v32  ;;  %v53_v32 = vlaneseq }
  0x2b   :  { %556 = vmatmul.mubr.bf16.vlgmr.msra.gmra.mxu1 %v1686_v34  ;;  %1483 = vmatpush3.bf16.msra.mxu0 %v1690_v37 }
  0x2c   :  { %1484 = vmatprep.subr.bf16.mxu0 %v1691_v38  ;;  %596 = vmatprep.mubr.bf16.mxu0 %v1707_v47  ;;  %v54_v33 = vshrl.u32 %v53_v32, 7 }
  0x2d   :  { %1550 = vmatpush3.bf16.msra.mxu1 %v1708_v55  ;;  %1565 = vmatprep.mubr.msk.bf16.mxu1 %vm1757_vm0, %v1756_v54 }
  0x2e   :  { %1551 = vmatprep.subr.bf16.mxu1 %v1756_v54  ;;  %vm56_vm1 = vcmp.lt.s32.totalorder %v54_v33, 2 }
  0x2f   :  { %1485 = vmatpush3.bf16.msra.mxu0 %v1692_v39  ;;  %v2078_v35 = vsel %vm56_vm1, 1.0, %v1756_v54 }
  0x30   :  { %1486 = vmatprep.subr.bf16.mxu0 %v1693_v40 }
  0x31   :  { %1552 = vmatpush3.bf16.msra.mxu1 %v1709_v56 }
  0x32   :  { %1553 = vmatprep.subr.bf16.mxu1 %v1756_v54 }
  0x33   :  { %1487 = vmatpush3.bf16.msra.mxu0 %v1694_v41 }
  0x34   :  { %1488 = vmatprep.subr.bf16.mxu0 %v1695_v42 }
  0x35   :  { %1554 = vmatpush3.bf16.msra.mxu1 %v1710_v57 }
  0x36   :  { %1555 = vmatprep.subr.bf16.mxu1 %v1756_v54 }
  0x37   :  { %1489 = vmatpush3.bf16.msra.mxu0 %v1696_v43 }
  0x38   :  { %1490 = vmatprep.subr.bf16.mxu0 %v1697_v44 }
  0x39   :  { %1556 = vmatpush3.bf16.msra.mxu1 %v1711_v58 }
  0x3a   :  { %1557 = vmatprep.subr.bf16.mxu1 %v1756_v54 }
  0x3b   :  { %1491 = vmatpush3.bf16.msra.mxu0 %v1698_v45 }
  0x3c   :  { %1492 = vmatprep.subr.bf16.mxu0 %v1699_v46 }
  0x3d   :  { %1558 = vmatpush3.bf16.msra.mxu1 %v1712_v59 }
  0x3e   :  { %1559 = vmatprep.subr.bf16.mxu1 %v1756_v54 }
  0x3f   :  { %1493 = vmatpush3.bf16.msra.mxu0 %v1700_v48 }
  0x40   :  { %1494 = vmatprep.subr.bf16.mxu0 %v1701_v49 }
  0x41   :  { %1560 = vmatpush3.bf16.msra.mxu1 %v1713_v60 }
  0x42   :  { %1561 = vmatprep.subr.bf16.mxu1 %v1756_v54 }
  0x43   :  { %1495 = vmatpush3.bf16.msra.mxu0 %v1702_v50 }
  0x44   :  { %1496 = vmatprep.subr.bf16.mxu0 %v1703_v51 }
  0x45   :  { %1562 = vmatpush3.bf16.msra.mxu1 %v1714_v61 }
  0x46   :  { %1563 = vmatprep.subr.bf16.mxu1 %v1756_v54 }
  0x47   :  { %1497 = vmatpush3.bf16.msra.mxu0 %v1704_v52 }
  0x48   :  { %1569 = vmatprep.subr.bf16.mxu0 %v1756_v54 }
  0x49   :  { %1564 = vmatpush3.bf16.msra.mxu1 %v1715_v62 }
  0x4a   :  { %597 = vmatmul.mubr.bf16.vlgmr.msra.gmra.mxu0 %v1705_v53  ;;  %1589 = vmatprep.subr.bf16.mxu1 %v1756_v54 }
  0x4b   :  { %1585 = vmatprep.mubr.msk.bf16.mxu0 %vm1757_vm0, %v1756_v54  ;;  %1570 = vmatpush3.bf16.msra.mxu0 %v1716_v24 }
  0x4c   :  { %1571 = vmatprep.subr.bf16.mxu0 %v1756_v54 }
  0x4f   :  { %1572 = vmatpush3.bf16.msra.mxu0 %v1717_v25 }
  0x50   :  { %1573 = vmatprep.subr.bf16.mxu0 %v1756_v54 }
  0x53   :  { %1574 = vmatpush3.bf16.msra.mxu0 %v1718_v26 }
  0x54   :  { %1575 = vmatprep.subr.bf16.mxu0 %v1756_v54 }
  0x57   :  { %1576 = vmatpush3.bf16.msra.mxu0 %v1719_v27 }
  0x58   :  { %1577 = vmatprep.subr.bf16.mxu0 %v1756_v54 }
  0x5b   :  { %1578 = vmatpush3.bf16.msra.mxu0 %v1720_v28 }
  0x5c   :  { %1579 = vmatprep.subr.bf16.mxu0 %v1756_v54 }
  0x5f   :  { %1580 = vmatpush3.bf16.msra.mxu0 %v1721_v29 }
  0x60   :  { %1581 = vmatprep.subr.bf16.mxu0 %v1756_v54 }
  0x63   :  { %1582 = vmatpush3.bf16.msra.mxu0 %v1722_v30 }
  0x64   :  { %1583 = vmatprep.subr.bf16.mxu0 %v1756_v54 }
  0x67   :  { %1584 = vmatpush3.bf16.msra.mxu0 %v1723_v31 }
  0x68   :  { %1609 = vmatprep.subr.bf16.mxu0 %v1756_v54 }
  0xea   :  { %v1454_v63 = vpop.f32.mrf.mxu0 }
  0xeb   :  { %v1476_v0 = vpop.f32.mrf.mxu1 }
  0xec   :  { %v1455_v1 = vpop.f32.mrf.mxu0 }
  0xed   :  { %v1477_v2 = vpop.f32.mrf.mxu1  ;;  %v1456_v8 = vadd.f32 %v1455_v1, %v1454_v63 }
  0xee   :  { %v1457_v3 = vpop.f32.mrf.mxu0  ;;  %v1478_v9 = vadd.f32 %v1477_v2, %v1476_v0  ;;  %v1398_v2 = vld [vmem:[%s2226_s3] ss:$0 sm:$0xff] }
  0xef   :  { %v1479_v4 = vpop.f32.mrf.mxu1 }
  0xf0   :  { %v1458_v5 = vpop.f32.mrf.mxu0  ;;  %v558_v15 = vadd.f32 %v1478_v9, %v1456_v8 }
  0xf1   :  { %v1480_v6 = vpop.f32.mrf.mxu1  ;;  %v1459_v11 = vadd.f32 %v1458_v5, %v1457_v3  ;;  %v1399_v5 = vld [vmem:[%s2227_s4] ss:$0 sm:$0xff] }
  0xf2   :  { %v1481_v12 = vadd.f32 %v1480_v6, %v1479_v4 }
  0xf4   :  { %v561_v17 = vadd.f32 %v1481_v12, %v1459_v11 }
 0x10a   :  { %v1498_v7 = vpop.f32.mrf.mxu0 }
 0x10c   :  { %v1499_v10 = vpop.f32.mrf.mxu0 }
 0x10d   :  { %v1500_v13 = vadd.f32 %v1499_v10, %v1498_v7 }
 0x10e   :  { %v1501_v14 = vpop.f32.mrf.mxu0 }
 0x10f   :  { %v599_v18 = vadd.f32 %v1500_v13, %v558_v15  ;;  %v1724_v13 = vld [vmem:[%s2228_s8 + $0x38] sm:$0xff]   ;;  %v1726_v15 = vld [vmem:[%s2228_s8 + $0x28] sm:$0xff]  }
 0x110   :  { %v1502_v16 = vpop.f32.mrf.mxu0 }
 0x111   :  { %v1503_v19 = vadd.f32 %v1502_v16, %v1501_v14  ;;  %v605_v21 = vmax.f32 %v599_v18, 0.0  ;;  %v1725_v14 = vld [vmem:[%s2228_s8 + $0x30] sm:$0xff]   ;;  %v1727_v16 = vld [vmem:[%s2228_s8 + $0x20] sm:$0xff]  }
 0x112   :  { %v1729_v18 = vld [vmem:[%s2228_s8 + $0x10] sm:$0xff]  }
 0x113   :  { %v602_v20 = vadd.f32 %v1503_v19, %v561_v17  ;;  %v1728_v17 = vld [vmem:[%s2228_s8 + $0x18] sm:$0xff]   ;;  %v1730_v19 = vld [vmem:[%s2228_s8 + $0x8] sm:$0xff]  }
 0x115   :  { %v606_v22 = vmax.f32 %v602_v20, 0.0  ;;  %v1731_v20 = vld [vmem:[%s2228_s8] sm:$0xff]  }
 0x117   :  { %v607_v23 = vpack.c.bf16 %v606_v22, %v605_v21 }
 0x119   :  { %1566 = vmatmul.mubr.bf16.vlgmr.msra.gmra.mxu1 %v607_v23 }
 0x11a   :  { %1605 = vmatprep.mubr.msk.bf16.mxu1 %vm1757_vm0, %v1756_v54  ;;  %1590 = vmatpush3.bf16.msra.mxu1 %v1724_v13 }
 0x11b   :  { %1591 = vmatprep.subr.bf16.mxu1 %v1756_v54 }
 0x11e   :  { %1592 = vmatpush3.bf16.msra.mxu1 %v1725_v14 }
 0x11f   :  { %1593 = vmatprep.subr.bf16.mxu1 %v1756_v54 }
 0x122   :  { %1594 = vmatpush3.bf16.msra.mxu1 %v1726_v15 }
 0x123   :  { %1595 = vmatprep.subr.bf16.mxu1 %v1756_v54 }
 0x126   :  { %1596 = vmatpush3.bf16.msra.mxu1 %v1727_v16 }
 0x127   :  { %1597 = vmatprep.subr.bf16.mxu1 %v1756_v54 }
 0x12a   :  { %1598 = vmatpush3.bf16.msra.mxu1 %v1728_v17 }
 0x12b   :  { %1599 = vmatprep.subr.bf16.mxu1 %v1756_v54 }
 0x12e   :  { %1600 = vmatpush3.bf16.msra.mxu1 %v1729_v18 }
 0x12f   :  { %1601 = vmatprep.subr.bf16.mxu1 %v1756_v54 }
 0x132   :  { %1602 = vmatpush3.bf16.msra.mxu1 %v1730_v19 }
 0x133   :  { %1603 = vmatprep.subr.bf16.mxu1 %v1756_v54 }
 0x136   :  { %1604 = vmatpush3.bf16.msra.mxu1 %v1731_v20 }
 0x137   :  { %1629 = vmatprep.subr.bf16.mxu1 %v1756_v54 }
 0x1d9   :  { %v706_v34 = vpop.f32.mrf.mxu1 }
 0x1da   :  { %v713_v38 = vmul.f32 %v2078_v35, %v706_v34 }
 0x1db   :  { %v1567_v36 = vpop.f32.mrf.mxu1 }
 0x1dd   :  { %v709_v37 = vpop.f32.mrf.mxu1 }
 0x1de   :  { %v714_v39 = vmul.f32 0.0, %v709_v37 }
 0x1df   :  { %v1568_v40 = vpop.f32.mrf.mxu1 }
 0x1e0   :  { %v715_v41 = vadd.f32 %v714_v39, %v713_v38 }
 0x1e2   :  { %v716_v42 = vrot.slane %v715_v41, 4 }
 0x1e4   :  { %v717_v43 = vadd.f32 %v716_v42, %v715_v41 }
 0x1e6   :  { %v718_v44 = vrot.slane %v717_v43, 2 }
 0x1e8   :  { %v719_v45 = vadd.f32 %v718_v44, %v717_v43 }
 0x1ea   :  { %v720_v46 = vrot.slane %v719_v45, 1 }
 0x1ec   :  { %v721_v47 = vadd.f32 %v720_v46, %v719_v45 }
 0x1ee   :  { %v722_v48 = vmul.f32 0.5, %v721_v47 }
 0x1f0   :  { %v723_v49 = vsub.f32 %v706_v34, %v722_v48  ;;  %v724_v50 = vsub.f32 %v709_v37, %v722_v48 }
 0x1f2   :  { %v725_v51 = vmul.f32 %v723_v49, %v723_v49  ;;  %v726_v52 = vmul.f32 %v724_v50, %v724_v50 }
 0x1f4   :  { %v727_v53 = vmul.f32 %v2078_v35, %v725_v51  ;;  %v728_v55 = vmul.f32 0.0, %v726_v52  ;;  %v1408_v52 = vld [vmem:[%s2229_s6] ss:$0 sm:$0xff] }
 0x1f6   :  { %v729_v56 = vadd.f32 %v728_v55, %v727_v53 }
 0x1f8   :  { %v730_v57 = vrot.slane %v729_v56, 4 }
 0x1fa   :  { %v731_v58 = vadd.f32 %v730_v57, %v729_v56  ;;  %v1409_v56 = vld [vmem:[%s2230_s7] ss:$0 sm:$0xff] }
 0x1fc   :  { %v732_v59 = vrot.slane %v731_v58, 2 }
 0x1fe   :  { %v733_v60 = vadd.f32 %v732_v59, %v731_v58 }
 0x200   :  { %v734_v61 = vrot.slane %v733_v60, 1 }
 0x202   :  { %v735_v62 = vadd.f32 %v734_v61, %v733_v60 }
 0x204   :  { %v736_v63 = vmul.f32 0.5, %v735_v62 }
 0x206   :  { %v737_v0 = vadd.f32 1e-05, %v736_v63 }
 0x208   :  { %1748 = vrsqrt.f32 %v737_v0  ;;  %v1732_v0 = vld [vmem:[%s2231_s10 + $0x38] sm:$0xff]  }
 0x215   :  { %v1749_v1 = vpop.eup %1748 }
 0x216   :  { %v739_v3 = vmul.f32 %v1749_v1, %v723_v49  ;;  %v740_v4 = vmul.f32 %v1749_v1, %v724_v50  ;;  %v1733_v1 = vld [vmem:[%s2231_s10 + $0x30] sm:$0xff]  }
 0x218   :  { %v748_v6 = vmul.f32 %v1398_v2, %v739_v3  ;;  %v749_v7 = vmul.f32 %v1398_v2, %v740_v4  ;;  %v1734_v2 = vld [vmem:[%s2231_s10 + $0x28] sm:$0xff]   ;;  %v1735_v3 = vld [vmem:[%s2231_s10 + $0x20] sm:$0xff]   ;;  %v1736_v4 = vld [vmem:[%s2231_s10 + $0x18] sm:$0xff]  }
 0x21a   :  { %v757_v8 = vadd.f32 %v1399_v5, %v748_v6  ;;  %v758_v9 = vadd.f32 %v1399_v5, %v749_v7  ;;  %v1737_v5 = vld [vmem:[%s2231_s10 + $0x10] sm:$0xff]   ;;  %v1738_v6 = vld [vmem:[%s2231_s10 + $0x8] sm:$0xff]   ;;  %v1739_v7 = vld [vmem:[%s2231_s10] sm:$0xff]  }
 0x21c   :  { %v760_v10 = vmax.f32 %v758_v9, 0.0  ;;  %v759_v11 = vmax.f32 %v757_v8, 0.0  ;;  %v1410_v8 = vld [vmem:[%s2232_s9] ss:$0 sm:$0xff] }
 0x21e   :  { %v761_v12 = vpack.c.bf16 %v760_v10, %v759_v11 }
 0x220   :  { %1586 = vmatmul.mubr.bf16.vlgmr.msra.gmra.mxu0 %v761_v12 }
 0x221   :  { %1625 = vmatprep.mubr.msk.bf16.mxu0 %vm1757_vm0, %v1756_v54  ;;  %1610 = vmatpush3.bf16.msra.mxu0 %v1732_v0 }
 0x222   :  { %1611 = vmatprep.subr.bf16.mxu0 %v1756_v54 }
 0x225   :  { %1612 = vmatpush3.bf16.msra.mxu0 %v1733_v1 }
 0x226   :  { %1613 = vmatprep.subr.bf16.mxu0 %v1756_v54 }
 0x229   :  { %1614 = vmatpush3.bf16.msra.mxu0 %v1734_v2 }
 0x22a   :  { %1615 = vmatprep.subr.bf16.mxu0 %v1756_v54 }
 0x22d   :  { %1616 = vmatpush3.bf16.msra.mxu0 %v1735_v3 }
 0x22e   :  { %1617 = vmatprep.subr.bf16.mxu0 %v1756_v54 }
 0x231   :  { %1618 = vmatpush3.bf16.msra.mxu0 %v1736_v4 }
 0x232   :  { %1619 = vmatprep.subr.bf16.mxu0 %v1756_v54 }
 0x235   :  { %1620 = vmatpush3.bf16.msra.mxu0 %v1737_v5 }
 0x236   :  { %1621 = vmatprep.subr.bf16.mxu0 %v1756_v54 }
 0x239   :  { %1622 = vmatpush3.bf16.msra.mxu0 %v1738_v6 }
 0x23a   :  { %1623 = vmatprep.subr.bf16.mxu0 %v1756_v54 }
 0x23d   :  { %1624 = vmatpush3.bf16.msra.mxu0 %v1739_v7 }
 0x2e0   :  { %v860_v21 = vpop.f32.mrf.mxu0 }
 0x2e1   :  { %v867_v24 = vmul.f32 %v2078_v35, %v860_v21 }
 0x2e2   :  { %v1587_v22 = vpop.f32.mrf.mxu0 }
 0x2e4   :  { %v863_v23 = vpop.f32.mrf.mxu0 }
 0x2e5   :  { %v868_v25 = vmul.f32 0.0, %v863_v23 }
 0x2e6   :  { %v1588_v26 = vpop.f32.mrf.mxu0 }
 0x2e7   :  { %v869_v27 = vadd.f32 %v868_v25, %v867_v24 }
 0x2e9   :  { %v870_v28 = vrot.slane %v869_v27, 4 }
 0x2eb   :  { %v871_v29 = vadd.f32 %v870_v28, %v869_v27 }
 0x2ed   :  { %v872_v30 = vrot.slane %v871_v29, 2 }
 0x2ef   :  { %v873_v31 = vadd.f32 %v872_v30, %v871_v29 }
 0x2f1   :  { %v874_v32 = vrot.slane %v873_v31, 1 }
 0x2f3   :  { %v875_v33 = vadd.f32 %v874_v32, %v873_v31 }
 0x2f5   :  { %v876_v34 = vmul.f32 0.5, %v875_v33 }
 0x2f7   :  { %v877_v36 = vsub.f32 %v860_v21, %v876_v34  ;;  %v878_v37 = vsub.f32 %v863_v23, %v876_v34 }
 0x2f9   :  { %v879_v38 = vmul.f32 %v877_v36, %v877_v36  ;;  %v880_v39 = vmul.f32 %v878_v37, %v878_v37 }
 0x2fb   :  { %v881_v40 = vmul.f32 %v2078_v35, %v879_v38  ;;  %v882_v41 = vmul.f32 0.0, %v880_v39 }
 0x2fd   :  { %v883_v42 = vadd.f32 %v882_v41, %v881_v40 }
 0x2ff   :  { %v884_v43 = vrot.slane %v883_v42, 4 }
 0x301   :  { %v885_v44 = vadd.f32 %v884_v43, %v883_v42 }
 0x303   :  { %v886_v45 = vrot.slane %v885_v44, 2 }
 0x305   :  { %v887_v46 = vadd.f32 %v886_v45, %v885_v44  ;;  %v1740_v45 = vld [vmem:[%s2234_s13 + $0x38] sm:$0xff]  }
 0x307   :  { %v888_v47 = vrot.slane %v887_v46, 1 }
 0x309   :  { %v889_v48 = vadd.f32 %v888_v47, %v887_v46  ;;  %v1741_v46 = vld [vmem:[%s2234_s13 + $0x30] sm:$0xff]   ;;  %v1742_v47 = vld [vmem:[%s2234_s13 + $0x28] sm:$0xff]  }
 0x30b   :  { %v890_v49 = vmul.f32 0.5, %v889_v48  ;;  %v1743_v48 = vld [vmem:[%s2234_s13 + $0x20] sm:$0xff]  }
 0x30d   :  { %v891_v50 = vadd.f32 1e-05, %v890_v49  ;;  %v1744_v49 = vld [vmem:[%s2234_s13 + $0x18] sm:$0xff]  }
 0x30f   :  { %1750 = vrsqrt.f32 %v891_v50  ;;  %v1745_v50 = vld [vmem:[%s2234_s13 + $0x10] sm:$0xff]  }
 0x31c   :  { %v1751_v51 = vpop.eup %1750 }
 0x31d   :  { %v893_v53 = vmul.f32 %v1751_v51, %v877_v36  ;;  %v894_v55 = vmul.f32 %v1751_v51, %v878_v37  ;;  %v1746_v51 = vld [vmem:[%s2234_s13 + $0x8] sm:$0xff]  }
 0x31f   :  { %v902_v57 = vmul.f32 %v1408_v52, %v893_v53  ;;  %v903_v58 = vmul.f32 %v1408_v52, %v894_v55  ;;  %v1747_v52 = vld [vmem:[%s2234_s13] sm:$0xff]  }
 0x321   :  { %v911_v59 = vadd.f32 %v1409_v56, %v902_v57  ;;  %v912_v60 = vadd.f32 %v1409_v56, %v903_v58 }
 0x323   :  { %v914_v61 = vmax.f32 %v912_v60, 0.0  ;;  %v913_v62 = vmax.f32 %v911_v59, 0.0 }
 0x325   :  { %v915_v63 = vpack.c.bf16 %v914_v61, %v913_v62 }
 0x327   :  { %1606 = vmatmul.mubr.bf16.vlgmr.msra.gmra.mxu1 %v915_v63 }
 0x328   :  { %1645 = vmatprep.mubr.msk.bf16.mxu1 %vm1757_vm0, %v1756_v54  ;;  %1630 = vmatpush3.bf16.msra.mxu1 %v1740_v45 }
 0x329   :  { %1631 = vmatprep.subr.bf16.mxu1 %v1756_v54 }
 0x32c   :  { %1632 = vmatpush3.bf16.msra.mxu1 %v1741_v46 }
 0x32d   :  { %1633 = vmatprep.subr.bf16.mxu1 %v1756_v54 }
 0x330   :  { %1634 = vmatpush3.bf16.msra.mxu1 %v1742_v47 }
 0x331   :  { %1635 = vmatprep.subr.bf16.mxu1 %v1756_v54 }
 0x334   :  { %1636 = vmatpush3.bf16.msra.mxu1 %v1743_v48 }
 0x335   :  { %1637 = vmatprep.subr.bf16.mxu1 %v1756_v54 }
 0x338   :  { %1638 = vmatpush3.bf16.msra.mxu1 %v1744_v49 }
 0x339   :  { %1639 = vmatprep.subr.bf16.mxu1 %v1756_v54 }
 0x33c   :  { %1640 = vmatpush3.bf16.msra.mxu1 %v1745_v50 }
 0x33d   :  { %1641 = vmatprep.subr.bf16.mxu1 %v1756_v54 }
 0x340   :  { %1642 = vmatpush3.bf16.msra.mxu1 %v1746_v51 }
 0x341   :  { %1643 = vmatprep.subr.bf16.mxu1 %v1756_v54 }
 0x344   :  { %1644 = vmatpush3.bf16.msra.mxu1 %v1747_v52 }
 0x3e7   :  { %v1021_v9 = vpop.f32.mrf.mxu1 }
 0x3e8   :  { %v1022_v11 = vadd.f32 %v1410_v8, %v1021_v9 }
 0x3e9   :  { %v1607_v10 = vpop.f32.mrf.mxu1 }
 0x3ea   :  { %v1028_v15 = vmul.f32 %v2078_v35, %v1022_v11 }
 0x3eb   :  { %v1024_v12 = vpop.f32.mrf.mxu1 }
 0x3ec   :  { %v1025_v13 = vadd.f32 %v1410_v8, %v1024_v12 }
 0x3ed   :  { %v1608_v14 = vpop.f32.mrf.mxu1 }
 0x3ee   :  { %v1029_v16 = vmul.f32 0.0, %v1025_v13 }
 0x3f0   :  { %v1030_v17 = vadd.f32 %v1029_v16, %v1028_v15 }
 0x3f2   :  { %v1031_v18 = vrot.slane %v1030_v17, 4 }
 0x3f4   :  { %v1032_v19 = vadd.f32 %v1031_v18, %v1030_v17 }
 0x3f6   :  { %v1033_v20 = vrot.slane %v1032_v19, 2 }
 0x3f8   :  { %v1034_v21 = vadd.f32 %v1033_v20, %v1032_v19  ;;  %v1427_v19 = vld [vmem:[%s2235_s11] ss:$0 sm:$0xff] }
 0x3fa   :  { %v1035_v22 = vrot.slane %v1034_v21, 1 }
 0x3fc   :  { %v1036_v23 = vadd.f32 %v1035_v22, %v1034_v21 }
 0x3fe   :  { %v1037_v24 = vmul.f32 0.5, %v1036_v23 }
 0x400   :  { %v1038_v25 = vsub.f32 %v1022_v11, %v1037_v24  ;;  %v1039_v26 = vsub.f32 %v1025_v13, %v1037_v24 }
 0x402   :  { %v1040_v27 = vmul.f32 %v1038_v25, %v1038_v25  ;;  %v1041_v28 = vmul.f32 %v1039_v26, %v1039_v26 }
 0x404   :  { %v1042_v29 = vmul.f32 %v2078_v35, %v1040_v27  ;;  %v1043_v30 = vmul.f32 0.0, %v1041_v28 }
 0x406   :  { %v1044_v31 = vadd.f32 %v1043_v30, %v1042_v29  ;;  %v1429_v29 = vld [vmem:[%s2237_s14] ss:$0 sm:$0xff] }
 0x408   :  { %v1045_v32 = vrot.slane %v1044_v31, 4 }
 0x40a   :  { %v1046_v33 = vadd.f32 %v1045_v32, %v1044_v31 }
 0x40c   :  { %v1047_v34 = vrot.slane %v1046_v33, 2 }
 0x40e   :  { %v1048_v36 = vadd.f32 %v1047_v34, %v1046_v33 }
 0x410   :  { %v1049_v37 = vrot.slane %v1048_v36, 1 }
 0x412   :  { %v1050_v38 = vadd.f32 %v1049_v37, %v1048_v36 }
 0x414   :  { %v1051_v39 = vmul.f32 0.5, %v1050_v38 }
 0x416   :  { %v1052_v40 = vadd.f32 1e-05, %v1051_v39 }
 0x418   :  { %1752 = vrsqrt.f32 %v1052_v40 }
 0x425   :  { %v1753_v41 = vpop.eup %1752 }
 0x426   :  { %v1054_v42 = vmul.f32 %v1753_v41, %v1038_v25  ;;  %v1055_v43 = vmul.f32 %v1753_v41, %v1039_v26 }
 0x428   :  { %v1056_v44 = vpack.c.bf16 %v1055_v43, %v1054_v42  ;;  %1325 = vst [vmem:[%s2233_s16] sm:$0xff] %v1054_v42  ;;  %1326 = vst [vmem:[%s2233_s16 + $0x8] sm:$0xff] %v1055_v43 }
 0x42a   :  { %1626 = vmatmul.mubr.bf16.vlgmr.msra.gmra.mxu0 %v1056_v44 }
 0x4ea   :  { %v1155_v53 = vpop.f32.mrf.mxu0 }
 0x4eb   :  { %v1162_v57 = vmul.f32 %v2078_v35, %v1155_v53 }
 0x4ec   :  { %v1627_v55 = vpop.f32.mrf.mxu0 }
 0x4ee   :  { %v1158_v56 = vpop.f32.mrf.mxu0 }
 0x4ef   :  { %v1163_v58 = vmul.f32 0.0, %v1158_v56 }
 0x4f0   :  { %v1628_v59 = vpop.f32.mrf.mxu0 }
 0x4f1   :  { %v1164_v60 = vadd.f32 %v1163_v58, %v1162_v57 }
 0x4f3   :  { %v1165_v61 = vrot.slane %v1164_v60, 4 }
 0x4f5   :  { %v1166_v62 = vadd.f32 %v1165_v61, %v1164_v60 }
 0x4f7   :  { %v1167_v63 = vrot.slane %v1166_v62, 2 }
 0x4f9   :  { %v1168_v0 = vadd.f32 %v1167_v63, %v1166_v62 }
 0x4fb   :  { %v1169_v1 = vrot.slane %v1168_v0, 1 }
 0x4fd   :  { %v1170_v2 = vadd.f32 %v1169_v1, %v1168_v0 }
 0x4ff   :  { %v1171_v54 = vmul.f32 0.5, %v1170_v2 }
 0x501   :  { %v1172_v3 = vsub.f32 %v1155_v53, %v1171_v54  ;;  %v1173_v4 = vsub.f32 %v1158_v56, %v1171_v54 }
 0x503   :  { %v1174_v5 = vmul.f32 %v1172_v3, %v1172_v3  ;;  %v1175_v6 = vmul.f32 %v1173_v4, %v1173_v4 }
 0x505   :  { %v1176_v7 = vmul.f32 %v2078_v35, %v1174_v5  ;;  %v1177_v8 = vmul.f32 0.0, %v1175_v6  ;;  %v1428_v35 = vld [vmem:[%s2236_s12] ss:$0 sm:$0xff] }
 0x507   :  { %v1178_v9 = vadd.f32 %v1177_v8, %v1176_v7 }
 0x509   :  { %v1179_v10 = vrot.slane %v1178_v9, 4 }
 0x50b   :  { %v1180_v11 = vadd.f32 %v1179_v10, %v1178_v9 }
 0x50d   :  { %v1181_v12 = vrot.slane %v1180_v11, 2 }
 0x50f   :  { %v1182_v13 = vadd.f32 %v1181_v12, %v1180_v11 }
 0x511   :  { %v1183_v14 = vrot.slane %v1182_v13, 1 }
 0x513   :  { %v1184_v15 = vadd.f32 %v1183_v14, %v1182_v13 }
 0x515   :  { %v1185_v16 = vmul.f32 0.5, %v1184_v15 }
 0x517   :  { %v1186_v17 = vadd.f32 1e-05, %v1185_v16 }
 0x519   :  { %1754 = vrsqrt.f32 %v1186_v17 }
 0x526   :  { %v1755_v18 = vpop.eup %1754 }
 0x527   :  { %v1188_v20 = vmul.f32 %v1755_v18, %v1172_v3  ;;  %v1189_v21 = vmul.f32 %v1755_v18, %v1173_v4 }
 0x529   :  { %v1197_v22 = vmul.f32 %v1427_v19, %v1188_v20  ;;  %v1198_v23 = vmul.f32 %v1427_v19, %v1189_v21 }
 0x52b   :  { %v1206_v24 = vadd.f32 %v1428_v35, %v1197_v22  ;;  %v1207_v25 = vadd.f32 %v1428_v35, %v1198_v23 }
 0x52d   :  { %v1209_v26 = vmax.f32 %v1207_v25, 0.0  ;;  %v1208_v27 = vmax.f32 %v1206_v24, 0.0 }
 0x52f   :  { %v1210_v28 = vpack.c.bf16 %v1209_v26, %v1208_v27 }
 0x531   :  { %1646 = vmatmul.mubr.bf16.vlgmr.msra.gmra.mxu1 %v1210_v28 }
 0x5f1   :  { %v1316_v30 = vpop.f32.mrf.mxu1 }
 0x5f2   :  { %v1317_v31 = vadd.f32 %v1429_v29, %v1316_v30 }
 0x5f3   :  { %v1647_v32 = vpop.f32.mrf.mxu1 }
 0x5f4   :  { %1323 = vst [vmem:[%s2238_s15] sm:$0xff] %v1317_v31 }
 0x5f5   :  { %v1319_v33 = vpop.f32.mrf.mxu1 }
 0x5f6   :  { %v1320_v34 = vadd.f32 %v1429_v29, %v1319_v33 }
 0x5f7   :  { %v1648_v36 = vpop.f32.mrf.mxu1 }
 0x5f8   :  { %1324 = vst [vmem:[%s2238_s15 + $0x8] sm:$0xff] %v1320_v34 }

</bundles_post_ra>
